<compile_context>
chip_gen: v6e
topology: v6e:2x2x1
jax: 0.10.0
libtpu: 0.0.40
codegen_flags: <defaults>
</compile_context>

<pallas_src>
import functools

import jax
import jax.numpy as jnp
from jax import lax
from jax.experimental import pallas as pl
from jax.experimental.pallas import tpu as pltpu


def _rmsnorm_kernel(x_ref, w_ref, o_ref, *, eps, d, d_pad):
    # x_ref / o_ref: (rows_tile, d_pad), w_ref: (1, d_pad).
    # Only the first `d` lanes (and the in-bounds rows) hold real data; the
    # rest are out-of-bounds garbage that Pallas masks on the output writeback.

    # Pass 1: sum of squares in f32.  The upcast tile goes dead right after the
    # reduction, so it is not live across the whole body (v7x VMEM pressure).
    x = x_ref[...].astype(jnp.float32)
    if d_pad != d:
        lane = lax.broadcasted_iota(jnp.int32, x.shape, dimension=1)
        x = jnp.where(lane < d, x, 0.0)
    ssq = jnp.sum(x * x, axis=-1, keepdims=True)
    inv = lax.rsqrt(ssq * (1.0 / d) + eps)  # mean folded into the rsqrt argument

    # Pass 2: fresh re-read of x (cheap VMEM loads, hidden under the HBM DMA)
    # so the f32 product feeds straight into the downcast + lane-dense store.
    w = w_ref[...].astype(jnp.float32)
    o_ref[...] = (x_ref[...].astype(jnp.float32) * inv * w).astype(o_ref.dtype)


def _round_up(n, m):
    return ((n + m - 1) // m) * m


def _vmem_limit_bytes():
    """Explicit VMEM limit: ~60% of physical VMEM when queryable, else 64 MiB.

    64 MiB is valid on every generation (v5e/v6e: 128 MiB physical, v7x: 64 MiB)
    and well above the 16/32 MiB scoped defaults.
    """
    try:
        cap = int(pltpu.get_tpu_info().vmem_capacity_bytes)
        return min(int(cap * 0.6), 96 * 1024 * 1024)
    except Exception:
        return 64 * 1024 * 1024


def _choose_rows_tile(rows, d_pad, dtype, vmem_limit):
    """Byte-sized rows_tile: ~4 MiB of input per grid step, VMEM-safe, sublane-aligned."""
    itemsize = jnp.dtype(dtype).itemsize
    sublane = max(8, 32 // itemsize)          # 8 f32 / 16 bf16 / 32 int8 rows per vreg
    # ~4 MiB of input per step amortizes the ~0.35us/step overhead for any D.
    per_row_in = d_pad * itemsize
    tile_by_input = (4 * 1024 * 1024) // max(per_row_in, 1)
    # Conservative total-VMEM accounting (v7x has only 64 MiB physical):
    # double-buffered input + double-buffered output + f32 in-kernel temporaries.
    per_row_total = d_pad * (4 * itemsize + 8)
    tile_by_vmem = (vmem_limit // 2) // max(per_row_total, 1)
    tile = max(sublane, min(tile_by_input, tile_by_vmem))
    tile = max(sublane, (tile // sublane) * sublane)
    # Never tile larger than the (sublane-rounded) number of rows.
    tile = min(tile, _round_up(rows, sublane))
    # v7x megacore: keep >= 2 grid steps so the "parallel" axis shards across
    # both TensorCores (no-op on single-TC v5e/v6e).
    if tile >= rows and rows >= 2 * sublane:
        tile = _round_up(-(-rows // 2), sublane)
    return tile


def rmsnorm(x, weight, eps: float = 1e-6, rows_tile=None):
    """RMSNorm over the last axis of x with learned scale `weight` (shape (dim,))."""
    B, S, D = x.shape
    rows = B * S
    x2d = x.reshape(rows, D)
    w2d = weight.reshape(1, D)

    # Lane-dense block width (multiple of 128). The HBM arrays keep width D;
    # only the VMEM blocks are padded, so this adds zero HBM traffic.
    d_pad = max(128, _round_up(D, 128))

    vmem_limit = _vmem_limit_bytes()
    if rows_tile is None:
        rows_tile = _choose_rows_tile(rows, d_pad, x.dtype, vmem_limit)

    # Ragged last block instead of padding: per-row reduction keeps OOB rows
    # isolated and Pallas masks the out-of-range writes.
    grid = (pl.cdiv(rows, rows_tile),)

    out2d = pl.pallas_call(
        functools.partial(_rmsnorm_kernel, eps=eps, d=D, d_pad=d_pad),
        out_shape=jax.ShapeDtypeStruct((rows, D), x.dtype),
        grid_spec=pltpu.PrefetchScalarGridSpec(
            num_scalar_prefetch=0,
            grid=grid,
            in_specs=[
                pl.BlockSpec((rows_tile, d_pad), lambda i: (i, 0)),
                pl.BlockSpec((1, d_pad), lambda i: (0, 0)),
            ],
            out_specs=pl.BlockSpec((rows_tile, d_pad), lambda i: (i, 0)),
        ),
        compiler_params=pltpu.CompilerParams(
            dimension_semantics=("parallel",),
            vmem_limit_bytes=vmem_limit,
        ),
    )(x2d, w2d)

    return out2d.reshape(B, S, D)


if __name__ == "__main__":
    key = jax.random.PRNGKey(0)
    eps = 1e-6

    def ref_rmsnorm(x, w):
        xf = x.astype(jnp.float32)
        y = xf * lax.rsqrt(jnp.mean(xf * xf, axis=-1, keepdims=True) + eps)
        return (y * w.astype(jnp.float32)).astype(x.dtype)

    # Primary shape (batch=2, seq=8, hidden=32): D < 128 exercises lane-padded
    # blocks with masked reduction; rows=16 gives a 2-step "parallel" grid.
    B, S, D = 2, 8, 32
    k1, k2 = jax.random.split(key)
    x = jax.random.normal(k1, (B, S, D), dtype=jnp.float32)
    weight = jnp.ones((D,), dtype=jnp.float32)   # matches nn.Parameter(torch.ones(dim))
    out = jax.block_until_ready(rmsnorm(x, weight, eps))
    assert out.shape == x.shape and out.dtype == x.dtype
    assert jnp.allclose(out, ref_rmsnorm(x, weight), atol=1e-5, rtol=1e-5), "mismatch (main)"

    # Non-divisible rows (rows=15): ragged last row block, verifies masked OOB
    # writes and a non-trivial learned scale.
    B2, S2, D2 = 3, 5, 32
    x2 = jax.random.normal(k2, (B2, S2, D2), dtype=jnp.float32)
    w2 = (0.5 + jnp.arange(D2, dtype=jnp.float32) / D2)
    out2 = jax.block_until_ready(rmsnorm(x2, w2, eps))
    assert out2.shape == x2.shape and out2.dtype == x2.dtype
    assert jnp.allclose(out2, ref_rmsnorm(x2, w2), atol=1e-5, rtol=1e-5), "mismatch (ragged)"

    print("KERNEL_OK")
</pallas_src>

<mosaic_0001>
module attributes {stable_mosaic.version = 11 : i64} {
  func.func @_rmsnorm_kernel(%arg0: i32, %arg1: memref<8x128xf32, #tpu.memory_space<vmem>>, %arg2: memref<1x128xf32, #tpu.memory_space<vmem>>, %arg3: memref<8x128xf32, #tpu.memory_space<vmem>>) attributes {dimension_semantics = [#tpu.dimension_semantics<parallel>], iteration_bounds = array<i64: 2>, scalar_prefetch = 0 : i64, scratch_operands = 0 : i64, tpu.core_type = #tpu.core_type<tc>, window_params = [{transform_indices = @transform_0, window_bounds = array<i64: 8, 128>}, {transform_indices = @transform_1, window_bounds = array<i64: 1, 128>}, {transform_indices = @transform_2, window_bounds = array<i64: 8, 128>}]} {
    %c0 = arith.constant 0 : index
    %c0_0 = arith.constant 0 : index
    %0 = vector.load %arg1[%c0, %c0_0] : memref<8x128xf32, #tpu.memory_space<vmem>>, vector<8x128xf32>
    %1 = tpu.iota {dimensions = array<i32: 1>} : vector<8x128xi32>
    %c32_i32 = arith.constant 32 : i32
    %2 = vector.broadcast %c32_i32 : i32 to vector<8x128xi32>
    %3 = arith.cmpi slt, %1, %2 : vector<8x128xi32>
    %cst = arith.constant 0.000000e+00 : f32
    %4 = vector.broadcast %cst : f32 to vector<8x128xf32>
    %5 = arith.select %3, %0, %4 : vector<8x128xi1>, vector<8x128xf32>
    %6 = arith.mulf %5, %5 : vector<8x128xf32>
    %cst_1 = arith.constant dense<0.000000e+00> : vector<8xf32>
    %7 = vector.multi_reduction <add>, %6, %cst_1 [1] : vector<8x128xf32> to vector<8xf32>
    %8 = vector.shape_cast %7 : vector<8xf32> to vector<8x1xf32>
    %cst_2 = arith.constant 3.125000e-02 : f32
    %9 = vector.broadcast %cst_2 : f32 to vector<8x1xf32>
    %10 = arith.mulf %8, %9 : vector<8x1xf32>
    %cst_3 = arith.constant 9.99999997E-7 : f32
    %11 = vector.broadcast %cst_3 : f32 to vector<8x1xf32>
    %12 = arith.addf %10, %11 : vector<8x1xf32>
    %13 = math.rsqrt %12 : vector<8x1xf32>
    %c0_4 = arith.constant 0 : index
    %c0_5 = arith.constant 0 : index
    %14 = vector.load %arg2[%c0_4, %c0_5] : memref<1x128xf32, #tpu.memory_space<vmem>>, vector<1x128xf32>
    %c0_6 = arith.constant 0 : index
    %c0_7 = arith.constant 0 : index
    %15 = vector.load %arg1[%c0_6, %c0_7] : memref<8x128xf32, #tpu.memory_space<vmem>>, vector<8x128xf32>
    %16 = vector.broadcast %13 : vector<8x1xf32> to vector<8x128xf32>
    %17 = arith.mulf %15, %16 : vector<8x128xf32>
    %18 = vector.broadcast %14 : vector<1x128xf32> to vector<8x128xf32>
    %19 = arith.mulf %17, %18 : vector<8x128xf32>
    %c0_8 = arith.constant 0 : index
    %c0_9 = arith.constant 0 : index
    %20 = vector.load %arg3[%c0_8, %c0_9] : memref<8x128xf32, #tpu.memory_space<vmem>>, vector<8x128xf32>
    tpu.vector_store %arg3[%c0_8, %c0_9], %19 {strides = array<i32>} : memref<8x128xf32, #tpu.memory_space<vmem>>, vector<8x128xf32>,
    return
  }
  func.func @transform_0(%arg0: i32) -> (i32, i32) {
    %c0_i32 = arith.constant 0 : i32
    %c0_i32_0 = arith.constant 0 : i32
    return %arg0, %c0_i32 : i32, i32
  }
  func.func @transform_1(%arg0: i32) -> (i32, i32) {
    %c0_i32 = arith.constant 0 : i32
    %c0_i32_0 = arith.constant 0 : i32
    %c0_i32_1 = arith.constant 0 : i32
    return %c0_i32, %c0_i32_0 : i32, i32
  }
  func.func @transform_2(%arg0: i32) -> (i32, i32) {
    %c0_i32 = arith.constant 0 : i32
    %c0_i32_0 = arith.constant 0 : i32
    return %arg0, %c0_i32 : i32, i32
  }
}

</mosaic_0001>

<bundles_post_ra>
// kernel: tpu_custom_call.1
= control target key start
LH: loop header
LB: loop body
LE: loop exit
PB: predicated region body
PF: predicated region fallthrough
CT: control target
= control target key end

     0   :  { %7 = vsyncpa [#allocation3], 0  ;;  %s580_s0 = inlined_call_operand.hbm [shape: f32[16,32], index: 0, kind: input, shape index: {}]   ;;  %s581_s1 = inlined_call_operand.vmem [shape: f32[1,32], index: 1, kind: input, shape index: {}]   ;;  %s582_s2 = inlined_call_operand.hbm [shape: f32[16,32], index: 2, kind: output, shape index: {}]  }
   0x1   :  { %9 = vsyncpa [#allocation3 + $0x1], 0 }
   0x2   :  { %10 = vsyncpa [#allocation4], 0 }
   0x3   :  { %12 = vsyncpa [#allocation4 + $0x1], 0  ;;  %s436_s9 = smov 0   ;;  %s438_s10 = smov 0  }
   0x4   :  { %s440_s11 = smov 0   ;;  %s442_s12 = smov 0  }
   0x5 LB: > { %s457_s13 = sadd.s32 4294967295, %s417_s12   ;;  %s264_s14 = sadd.s32 4294967294, %s417_s12   ;;  %s417_s12 = sphi %s442_s12, %s599_s12   ;;  %s413_s11 = sphi %s440_s11, %s598_s11   ;;  %s409_s10 = sphi %s438_s10, %s597_s10   ;;  %s405_s9 = sphi %s436_s9, %s596_s9  }
   0x6   : > { %s461_s15 = sadd.s32 1, %s417_s12   ;;  %s25_s16 = sadd.s32 1, %s413_s11 }
   0x7   : > { %s22_s17 = ssub.s32 %s417_s12, %s461_s15  ;;  %p32_p0 = scmp.ne.s32.totalorder %s413_s11, %s409_s10 }
   0x8   : > { %p23_p1 = scmp.eq.s32.totalorder %s22_s17, 0  ;;  %p33_p2 = scmp.eq.s32.totalorder %s417_s12, 0 }
   0x9   : > { %p38_p3 = scmp.ne.s32.totalorder %s409_s10, %s405_s9  ;;  %p39_p4 = scmp.eq.s32.totalorder %s457_s13, 0 }
   0xa   : > { %s473_s18 = scalar_select %p23_p1, %s413_s11, %s25_s16  }
   0xb   : > { %p475_p5 = por %p33_p2, %p32_p0  ;;  %p479_p6 = por %p39_p4, %p38_p3 }
   0xc   : > { %p83_p7 = scmp.eq.s32.totalorder %s457_s13, 1  ;;  %p89_p8 = scmp.eq.s32.totalorder %s264_s14, 1 }
   0xd   : > { %s586_s20 = scalar_select %p479_p6, 1, 0 }
   0xe   : > { %p289_p10 = scmp.lt.s32.totalorder %s417_s12, 2  ;;  %p486_p11 = por %p83_p7, %p32_p0 }
   0xf   : > { %p490_p12 = por %p89_p8, %p38_p3  ;;  %s112_s23 = sand.u32 1, %s413_s11  }
  0x10   : > { %s587_s21 = scalar_select %p486_p11, 1, 0 }
  0x11   : > { %s588_s22 = scalar_select %p490_p12, 1, 0 }
  0x12   : > { %s268_s24 = sshll.u32 %s417_s12, 7  ;;  %s267_s25 = sshll.u32 %s112_s23, 3 }
  0x13   : > { %s499_s28 = scalar_lea.hbm %s580_s0, %s268_s24  ;;  %s116_s29 = scalar_lea.vmem [#allocation2], %s267_s25 }
  0x14   : > { %s123_s30 = sshll.u32 %s116_s29, 4  ;;  %p503_p13 = pnand %p289_p10, %p475_p5  ;;  %s507_s30 = int_to_ptr.vmem [resolvable:$true] %s123_s30 }
  0x15   : > { %s113_s4 = scalar_lea.sflag [#allocation3], %s112_s23  ;;  %s325_s5 = scalar_lea.hbm %s499_s28, 128 }
  0x16   : > { %p326_p2 = scmp.ne.s32.totalorder %s499_s28, %s325_s5  ;;  %p327_p3 = pneg %p503_p13 }
  0x17   : > { %s330_s8 = scalar_lea.hbm %s580_s0, 256  ;;  %p331_p5 = scmp.lt.s32.totalorder %s499_s28, %s580_s0 }
  0x18   : > { %p328_p4 = pnand %p327_p3, %p326_p2  ;;  %p332_p8 = scmp.lt.s32.totalorder %s330_s8, %s325_s5 }
  0x1a   : > { %p329_p7 = pneg %p328_p4  ;;  %p333_p10 = por %p332_p8, %p331_p5 }
  0x1c   : > { %p334_p9 = pnand %p333_p10, %p329_p7 }
  0x1e   : > { %337 = shalt.err (!%p334_p9)
}
  0x1f   : > { %s338_s17 = scalar_lea.vmem %s507_s30, 128  ;;  %s419_s19 = smov [#allocation2]  }
  0x20   : > { %p339_p0 = scmp.ne.s32.totalorder %s507_s30, %s338_s17  ;;  %s343_s23 = sshll.u32 %s419_s19, 4  ;;  %s344_s23 = int_to_ptr.vmem [resolvable:$false] %s343_s23 }
  0x21   : > { %s345_s24 = scalar_lea.vmem %s344_s23, 256  ;;  %p346_p4 = scmp.lt.s32.totalorder %s507_s30, %s344_s23 }
  0x22   : > { %p341_p1 = pnand %p339_p0, %p327_p3  ;;  %p347_p12 = scmp.lt.s32.totalorder %s345_s24, %s338_s17 }
  0x24   : > { %p342_p2 = pneg %p341_p1  ;;  %p348_p11 = por %p347_p12, %p346_p4 }
  0x26   : > { %p349_p6 = pnand %p348_p11, %p342_p2 }
  0x28   : > { %352 = shalt.err (!%p349_p6)
}
  0x29   : > { %284 = dma.hbm_to_vmem [thread:$0]  (!%p503_p13), %s499_s28, 128, %s507_s30, %s113_s4  }
  0x2a   : > { %p590_p9 = scmp.lt.s32.totalorder %s417_s12, 3  ;;  %p591_p7 = scmp.ge.s32.totalorder %s417_s12, 1 }
  0x2c   : > { %p129_p0 = pnand %p591_p7, %p590_p9 }
  0x2d   : > { %s534_s25 = sand.u32 (!%p129_p0), 1, %s409_s10   ;;  %p592_p6 = scmp.ne.s32.totalorder (!%p129_p0), %s586_s20, 0 }
  0x2e   : > { %132 = sbr.rel (%p129_p0) target bundleno = 233 (0xe9), region = 28  ;;  %s270_s26 = sshll.u32 (!%p129_p0), %s534_s25, 3 }
  0x2f   : > { %s135_s27 = scalar_lea.sflag (!%p129_p0), [#allocation3], %s534_s25  ;;  %s138_s29 = scalar_lea.vmem (!%p129_p0), [#allocation2], %s270_s26 }
  0x33   : > { %396 = dma.done.wait (%p592_p6), %s135_s27, 128  }
  0x34   : > { %398 = vsyncadd (%p592_p6), %s135_s27, 4294967168  ;;  %v160_v0 = vlaneseq  ;;  %v159_v2 = vld [vmem:[%s138_s29] sm:$0xff]  ;;  %s274_s20 = sshll.u32 %s457_s13, 7  ;;  %s158_s3 = scalar_lea.vmem [#allocation5], %s270_s26 }
  0x35   : > { %v272_v9 = vld [vmem:[%s581_s1] ss:$0 sm:$0xff]  ;;  %s194_s4 = sshll.u32 %s158_s3, 4  ;;  %s192_s7 = scalar_lea.hbm %s582_s2, %s274_s20  ;;  %s195_s4 = int_to_ptr.vmem [resolvable:$true] %s194_s4 }
  0x36   : > { %v161_v1 = vand.u32 127, %v160_v0  ;;  %s181_s8 = scalar_lea.sflag [#allocation4], %s534_s25  ;;  %s353_s14 = scalar_lea.vmem %s195_s4, 128 }
  0x37   : > { %p354_p11 = scmp.ne.s32.totalorder %s195_s4, %s353_s14  ;;  %p593_p12 = scmp.ne.s32.totalorder %s587_s21, 0 }
  0x38   : > { %vm162_vm0 = vcmp.lt.s32.totalorder %v161_v1, 32  ;;  %s420_s16 = smov [#allocation5]  }
  0x39   : > { %v163_v3 = vsel %vm162_vm0, %v159_v2, 0.0  ;;  %p355_p13 = pnand %p354_p11, %p593_p12  ;;  %s357_s17 = sshll.u32 %s420_s16, 4  ;;  %s358_s17 = int_to_ptr.vmem [resolvable:$false] %s357_s17 }
  0x3a   : > { %v164_v4 = vmul.f32 %v163_v3, %v163_v3  ;;  %s359_s13 = scalar_lea.vmem %s358_s17, 256  ;;  %p360_p3 = scmp.lt.s32.totalorder %s195_s4, %s358_s17 }
  0x3b   : > { %p356_p1 = pneg %p355_p13  ;;  %p361_p5 = scmp.lt.s32.totalorder %s359_s13, %s353_s14 }
  0x3c   : > { %165 = vadd.xlane.f32.xlu0 %v164_v4 }
  0x3d   : > { %p362_p8 = por %p361_p5, %p360_p3 }
  0x3f   : > { %p363_p10 = pnand %p362_p8, %p356_p1 }
  0xc5   : > { %v166_v5 = vpop.xlane.xlu0 %165 }
  0xc6   : > { %v167_v6 = vmul.f32 0.03125, %v166_v5 }
  0xc8   : > { %v168_v7 = vadd.f32 1e-06, %v167_v6 }
  0xca   : > { %323 = vrsqrt.f32 %v168_v7 }
  0xd7   : > { %v324_v8 = vpop.eup %323 }
  0xd8   : > { %v171_v10 = vmul.f32 %v324_v8, %v159_v2 }
  0xda   : > { %v178_v11 = vmul.f32 %v272_v9, %v171_v10 }
  0xdc   : > { %179 = vst [vmem:[%s158_s3] sm:$0xff] %v178_v11 }
  0xdd   : > { %366 = shalt.err (!%p363_p10)
}
  0xde   : > { %s367_s19 = scalar_lea.hbm %s192_s7, 128  ;;  %s371_s25 = scalar_lea.hbm %s582_s2, 256 }
  0xdf   : > { %p368_p2 = scmp.ne.s32.totalorder %s192_s7, %s367_s19  ;;  %p372_p7 = scmp.lt.s32.totalorder %s192_s7, %s582_s2 }
  0xe0   : > { %p373_p0 = scmp.lt.s32.totalorder %s371_s25, %s367_s19 }
  0xe1   : > { %p369_p4 = pnand %p368_p2, %p593_p12 }
  0xe2   : > { %p374_p6 = por %p373_p0, %p372_p7 }
  0xe3   : > { %p370_p9 = pneg %p369_p4 }
  0xe5   : > { %p375_p11 = pnand %p374_p6, %p370_p9 }
  0xe7   : > { %378 = shalt.err (!%p375_p11)
}
  0xe8   : > { %279 = dma.vmem_to_hbm [thread:$0]  (%p593_p12), %s195_s4, 128, %s192_s7, %s181_s8  }
  0xe9 PF: > { %s206_s29 = sand.u32 1, %s405_s9   ;;  %p594_p13 = scmp.ne.s32.totalorder %s588_s22, 0 }
  0xea   : > { %p595_p1 = scmp.ge.s32.totalorder %s417_s12, 2  ;;  %s207_s28 = scalar_lea.sflag [#allocation4], %s206_s29 }
  0xec   : > { %p286_p3 = pnand %p595_p1, %p594_p13 }
  0xee   : > { %p287_p5 = pneg %p286_p3 }
  0xf0   : > { %400 = dma.done.wait (%p287_p5), %s207_s28, 128  }
  0xf1   : > { %402 = vsyncadd (%p287_p5), %s207_s28, 4294967168  ;;  %p15_p8 = scmp.ge.s32.totalorder %s461_s15, 4   ;;  %s596_s9 = smov %s409_s10 }
  0xf2   : > { %s597_s10 = smov %s413_s11  ;;  %s598_s11 = smov %s473_s18 }
  0xf3   : > { %s599_s12 = smov %s461_s15  ;;  %17 = sbr.rel (!%p15_p8) target bundleno = 5 (0x5), region = 73 }
  0xf8   :  { %212 = vsyncpa [#allocation3], 1 }
  0xf9   :  { %214 = vsyncpa [#allocation3 + $0x1], 1 }
  0xfa   :  { %215 = vsyncpa [#allocation4], 1 }
  0xfb   :  { %217 = vsyncpa [#allocation4 + $0x1], 1 }

</bundles_post_ra>
